<compile_context>
chip_gen: v7x
topology: tpu7x:2x2x1
jax: 0.10.0
libtpu: 0.0.40
codegen_flags: <defaults>
</compile_context>

<pallas_src>
import jax
import jax.numpy as jnp
from jax.experimental import pallas as pl
from jax.experimental.pallas import tpu as pltpu

_N_CHARGE = 202 * 2            # 404
_N_ARTICLE = 183 * 2           # 366
_N_TERM = 1
_N_TOTAL = _N_CHARGE + _N_ARTICLE + _N_TERM   # 771
_LANE = 128
_N_PAD = ((_N_TOTAL + _LANE - 1) // _LANE) * _LANE   # 896 (lane-dense, unmasked stores)


def _round_up(x, m):
    return (x + m - 1) // m * m


def _fused_predictor_kernel(h_ref, w_ref, b_ref, out_ref):
    # One MXU pass per batch tile: [TB, H] @ [H, 896] + [1, 896] (f32 accumulate).
    out_ref[...] = (
        jnp.dot(h_ref[...], w_ref[...], preferred_element_type=jnp.float32)
        + b_ref[...]
    )


def pack_predictor_params(params, compute_dtype=jnp.bfloat16):
    """Concatenate the three heads along the output axis and pad to 896 lanes."""
    w = jnp.concatenate(
        [params["charge_w"], params["article_w"], params["term_w"]], axis=1)   # [H, 771]
    b = jnp.concatenate(
        [params["charge_b"], params["article_b"], params["term_b"]], axis=1)   # [1, 771]
    hidden = w.shape[0]
    w_pad = jnp.zeros((hidden, _N_PAD), compute_dtype).at[:, :_N_TOTAL].set(
        w.astype(compute_dtype))
    # Bias stays f32 (post-matmul elementwise in f32 everywhere, incl. v5e).
    b_pad = jnp.zeros((1, _N_PAD), jnp.float32).at[:, :_N_TOTAL].set(
        b.astype(jnp.float32))
    return w_pad, b_pad


def ljp_predictor_forward(h, params, *, compute_dtype=jnp.bfloat16, block_batch=512):
    """h: [batch, hidden].  Returns dict {'zm', 'ft', 'xq'} matching the PyTorch module."""
    batch, hidden = h.shape
    w_pad, b_pad = pack_predictor_params(params, compute_dtype)

    # Batch tile: multiple of 8 sublanes, capped at block_batch; pad batch to a
    # whole number of tiles so every BlockSpec block is full.
    tb = min(block_batch, _round_up(batch, 8))
    padded_batch = _round_up(batch, tb)

    h_c = h.astype(compute_dtype)
    if padded_batch != batch:
        h_c = jnp.zeros((padded_batch, hidden), compute_dtype).at[:batch].set(h_c)

    grid = (padded_batch // tb,)
    itemsize = jnp.dtype(compute_dtype).itemsize
    cost = pl.CostEstimate(
        flops=2 * padded_batch * hidden * _N_PAD,
        transcendentals=0,
        bytes_accessed=(padded_batch * hidden * itemsize          # h
                        + hidden * _N_PAD * itemsize              # packed W (resident)
                        + _N_PAD * 4                              # bias
                        + padded_batch * _N_PAD * 4),             # output
    )

    out = pl.pallas_call(
        _fused_predictor_kernel,
        out_shape=jax.ShapeDtypeStruct((padded_batch, _N_PAD), jnp.float32),
        grid_spec=pltpu.PrefetchScalarGridSpec(
            num_scalar_prefetch=0,
            grid=grid,
            in_specs=[
                # Activations: pipelined over the batch grid.
                pl.BlockSpec((tb, hidden), lambda i: (i, 0)),
                # Packed weights / bias: constant block -> VMEM-resident across steps.
                pl.BlockSpec((hidden, _N_PAD), lambda i: (0, 0)),
                pl.BlockSpec((1, _N_PAD), lambda i: (0, 0)),
            ],
            out_specs=pl.BlockSpec((tb, _N_PAD), lambda i: (i, 0)),
        ),
        compiler_params=pltpu.CompilerParams(
            dimension_semantics=("parallel",),   # lets v7x's 2 TCs split the batch tiles
        ),
        cost_estimate=cost,
    )(h_c, w_pad, b_pad)

    out = out[:batch]                                              # drop batch padding
    charge = out[:, :_N_CHARGE].reshape(batch, -1, 2)              # (batch, 202, 2)
    article = out[:, _N_CHARGE:_N_CHARGE + _N_ARTICLE].reshape(batch, -1, 2)  # (batch, 183, 2)
    term = out[:, _N_CHARGE + _N_ARTICLE]                          # (batch,)
    return {"zm": charge, "ft": article, "xq": term}


def init_params(key, hidden_size):
    """Deterministic synthetic parameters matching nn.Linear shapes
    (stored transposed: [in_features, out_features])."""
    ks = jax.random.split(key, 6)
    scale = 1.0 / jnp.sqrt(jnp.float32(hidden_size))
    return {
        "charge_w": jax.random.uniform(ks[0], (hidden_size, _N_CHARGE), jnp.float32, -scale, scale),
        "charge_b": jax.random.uniform(ks[1], (1, _N_CHARGE), jnp.float32, -scale, scale),
        "article_w": jax.random.uniform(ks[2], (hidden_size, _N_ARTICLE), jnp.float32, -scale, scale),
        "article_b": jax.random.uniform(ks[3], (1, _N_ARTICLE), jnp.float32, -scale, scale),
        "term_w": jax.random.uniform(ks[4], (hidden_size, _N_TERM), jnp.float32, -scale, scale),
        "term_b": jax.random.uniform(ks[5], (1, _N_TERM), jnp.float32, -scale, scale),
    }


if __name__ == "__main__":
    batch, hidden = 8, 32

    key = jax.random.PRNGKey(0)
    k_h, k_p = jax.random.split(key)
    h = jax.random.normal(k_h, (batch, hidden), jnp.float32)
    params = init_params(k_p, hidden)

    # Pure-JAX reference (matches the PyTorch forward).
    charge_ref = (h @ params["charge_w"] + params["charge_b"]).reshape(batch, -1, 2)
    article_ref = (h @ params["article_w"] + params["article_b"]).reshape(batch, -1, 2)
    term_ref = (h @ params["term_w"] + params["term_b"]).reshape(batch)

    # f32 path: tight numerical check of the fused/padded kernel.
    out_f32 = ljp_predictor_forward(h, params, compute_dtype=jnp.float32)
    jax.block_until_ready(out_f32)
    assert out_f32["zm"].shape == (batch, 202, 2)
    assert out_f32["ft"].shape == (batch, 183, 2)
    assert out_f32["xq"].shape == (batch,)
    assert jnp.allclose(out_f32["zm"], charge_ref, atol=1e-5)
    assert jnp.allclose(out_f32["ft"], article_ref, atol=1e-5)
    assert jnp.allclose(out_f32["xq"], term_ref, atol=1e-5)

    # bf16 path (production/HBM-bound setting): loose tolerance vs f32 reference.
    out_bf16 = ljp_predictor_forward(h, params, compute_dtype=jnp.bfloat16)
    jax.block_until_ready(out_bf16)
    assert out_bf16["zm"].shape == (batch, 202, 2)
    assert out_bf16["ft"].shape == (batch, 183, 2)
    assert out_bf16["xq"].shape == (batch,)
    assert jnp.allclose(out_bf16["zm"], charge_ref, atol=5e-2, rtol=5e-2)
    assert jnp.allclose(out_bf16["ft"], article_ref, atol=5e-2, rtol=5e-2)
    assert jnp.allclose(out_bf16["xq"], term_ref, atol=5e-2, rtol=5e-2)

    print("KERNEL_OK")
</pallas_src>

<mosaic_0001>
module attributes {stable_mosaic.version = 11 : i64} {
  func.func @_fused_predictor_kernel(%arg0: i32, %arg1: memref<8x32xf32, #tpu.memory_space<vmem>>, %arg2: memref<32x896xf32, #tpu.memory_space<vmem>>, %arg3: memref<1x896xf32, #tpu.memory_space<vmem>>, %arg4: memref<8x896xf32, #tpu.memory_space<vmem>>) attributes {dimension_semantics = [#tpu.dimension_semantics<parallel>], iteration_bounds = array<i64: 1>, scalar_prefetch = 0 : i64, scratch_operands = 0 : i64, tpu.core_type = #tpu.core_type<tc>, window_params = [{transform_indices = @transform_0, window_bounds = array<i64: 8, 32>}, {pipeline_mode = #tpu.pipeline_mode<synchronous>, transform_indices = @transform_1, window_bounds = array<i64: 32, 896>}, {pipeline_mode = #tpu.pipeline_mode<synchronous>, transform_indices = @transform_2, window_bounds = array<i64: 1, 896>}, {transform_indices = @transform_3, window_bounds = array<i64: 8, 896>}]} {
    %c0 = arith.constant 0 : index
    %c0_0 = arith.constant 0 : index
    %0 = vector.load %arg1[%c0, %c0_0] : memref<8x32xf32, #tpu.memory_space<vmem>>, vector<8x32xf32>
    %c0_1 = arith.constant 0 : index
    %c0_2 = arith.constant 0 : index
    %1 = vector.load %arg2[%c0_1, %c0_2] : memref<32x896xf32, #tpu.memory_space<vmem>>, vector<32x896xf32>
    %cst = arith.constant dense<0.000000e+00> : vector<8x896xf32>
    %2 = tpu.matmul %0, %1, %cst {dimension_numbers = #tpu.dot_dimension_numbers<[1], [0], [0], [1], [0, 0, 1, 1], [], []>} : vector<8x32xf32>, vector<32x896xf32>, vector<8x896xf32> -> vector<8x896xf32>
    %c0_3 = arith.constant 0 : index
    %c0_4 = arith.constant 0 : index
    %3 = vector.load %arg3[%c0_3, %c0_4] : memref<1x896xf32, #tpu.memory_space<vmem>>, vector<1x896xf32>
    %4 = vector.broadcast %3 : vector<1x896xf32> to vector<8x896xf32>
    %5 = arith.addf %2, %4 : vector<8x896xf32>
    %c0_5 = arith.constant 0 : index
    %c0_6 = arith.constant 0 : index
    %6 = vector.load %arg4[%c0_5, %c0_6] : memref<8x896xf32, #tpu.memory_space<vmem>>, vector<8x896xf32>
    tpu.vector_store %arg4[%c0_5, %c0_6], %5 {strides = array<i32>} : memref<8x896xf32, #tpu.memory_space<vmem>>, vector<8x896xf32>,
    return
  }
  func.func @transform_0(%arg0: i32) -> (i32, i32) {
    %c0_i32 = arith.constant 0 : i32
    %c0_i32_0 = arith.constant 0 : i32
    return %arg0, %c0_i32 : i32, i32
  }
  func.func @transform_1(%arg0: i32) -> (i32, i32) {
    %c0_i32 = arith.constant 0 : i32
    %c0_i32_0 = arith.constant 0 : i32
    %c0_i32_1 = arith.constant 0 : i32
    return %c0_i32, %c0_i32_0 : i32, i32
  }
  func.func @transform_2(%arg0: i32) -> (i32, i32) {
    %c0_i32 = arith.constant 0 : i32
    %c0_i32_0 = arith.constant 0 : i32
    %c0_i32_1 = arith.constant 0 : i32
    return %c0_i32, %c0_i32_0 : i32, i32
  }
  func.func @transform_3(%arg0: i32) -> (i32, i32) {
    %c0_i32 = arith.constant 0 : i32
    %c0_i32_0 = arith.constant 0 : i32
    return %arg0, %c0_i32 : i32, i32
  }
}

</mosaic_0001>

<bundles_post_ra>
// kernel: tpu_custom_call.1
= control target key start
LH: loop header
LB: loop body
LE: loop exit
PB: predicated region body
PF: predicated region fallthrough
CT: control target
= control target key end

     0   :  { %8 = vsyncpa [#allocation3], 0  ;;  %s629_s0 = inlined_call_operand.hbm [shape: f32[8,32], index: 0, kind: input, shape index: {}]   ;;  %s630_s1 = inlined_call_operand.hbm [shape: f32[32,896], index: 1, kind: input, shape index: {}]   ;;  %s631_s2 = inlined_call_operand.vmem [shape: f32[1,896], index: 2, kind: input, shape index: {}]   ;;  %s632_s3 = inlined_call_operand.hbm [shape: f32[8,896], index: 3, kind: output, shape index: {}]  }
   0x1   :  { %9 = vsyncpa [#allocation6], 0 }
   0x2   :  { %10 = vsyncpa [#allocation4], 0  ;;  %s547_s12 = smov [#allocation2]   ;;  %s548_s14 = smov [#allocation5]  }
   0x3   :  { %s17_s13 = sshll.u32 %s547_s12, 4  ;;  %s26_s15 = sshll.u32 %s548_s14, 4  ;;  %s18_s13 = int_to_ptr.vmem [resolvable:$true] %s17_s13  ;;  %s575_s15 = int_to_ptr.vmem [resolvable:$true] %s26_s15 }
   0x4   :  { %s475_s18 = scalar_lea.hbm %s629_s0, 128 }
   0x5   :  { %p476_p0 = scmp.ne.s32.totalorder %s629_s0, %s475_s18  ;;  %p479_p1 = scmp.lt.u32.totalorder %s475_s18, %s629_s0 }
   0x7   :  { %p481_p2 = pnand %p479_p1, %p476_p0 }
   0x9   :  { %484 = shalt.err (!%p481_p2)
}
   0xa   :  { %s485_s23 = scalar_lea.vmem %s18_s13, 128  ;;  %p490_p4 = scmp.lt.s32.totalorder %s18_s13, %s18_s13 }
   0xb   :  { %p486_p3 = scmp.ne.s32.totalorder %s18_s13, %s485_s23  ;;  %p491_p5 = scmp.lt.s32.totalorder %s485_s23, %s485_s23 }
   0xd   :  { %p492_p6 = por %p491_p5, %p490_p4 }
   0xf   :  { %p493_p7 = pnand %p492_p6, %p486_p3 }
  0x11   :  { %496 = shalt.err (!%p493_p7)
}
  0x12   :  { %20 = dma.hbm_to_vmem [thread:$0]  %s629_s0, 128, %s18_s13, [#allocation3]  }
  0x13   :  { %s497_s28 = scalar_lea.hbm %s630_s1, 3584 }
  0x14   :  { %p498_p8 = scmp.ne.s32.totalorder %s630_s1, %s497_s28  ;;  %p501_p9 = scmp.lt.u32.totalorder %s497_s28, %s630_s1 }
  0x16   :  { %p503_p10 = pnand %p501_p9, %p498_p8 }
  0x18   :  { %506 = shalt.err (!%p503_p10)
}
  0x19   :  { %s507_s6 = scalar_lea.vmem %s575_s15, 3584  ;;  %p512_p12 = scmp.lt.s32.totalorder %s575_s15, %s575_s15 }
  0x1a   :  { %p508_p11 = scmp.ne.s32.totalorder %s575_s15, %s507_s6  ;;  %p513_p13 = scmp.lt.s32.totalorder %s507_s6, %s507_s6 }
  0x1c   :  { %p514_p0 = por %p513_p13, %p512_p12 }
  0x1e   :  { %p515_p1 = pnand %p514_p0, %p508_p11 }
  0x20   :  { %518 = shalt.err (!%p515_p1)
}
  0x21   :  { %s549_s0 = smov 896   ;;  %s550_s7 = smov 56  }
  0x22   :  { %32 = dma.hbm_to_vmem [thread:$0]  %s630_s1, 3584, %s575_s15, [#allocation6], %s549_s0, %s549_s0, %s550_s7  }
  0x23   :  { %541 = dma.done.wait [#allocation3], 128  }
  0x24   :  { %542 = vsyncadd [#allocation3], 4294967168 }
  0x25   :  { %543 = dma.done.wait [#allocation6], 3584  }
  0x26   :  { %544 = vsyncadd [#allocation6], 4294963712  ;;  %v551_v0 = vmov 0.0   ;;  %v43_v1 = vld [vmem:[#allocation5 + $0x8] sm:$0xff]  ;;  %v50_v2 = vld [vmem:[#allocation5 + $0x40] sm:$0xff]  ;;  %vm107_vm0 = vcmask 261120   ;;  %v72_v45 = vlaneseq }
  0x27   :  { %175 = vmatprep.mubr.f32.mxu0 %v551_v0  ;;  %246 = vmatprep.mubr.f32.mxu1 %v551_v0  ;;  %v45_v3 = vld [vmem:[#allocation5 + $0x18] sm:$0xff]  ;;  %v437_v4 = vpack.c.bf16 %v50_v2, %v43_v1  ;;  %v52_v5 = vld [vmem:[#allocation5 + $0x50] sm:$0xff]  ;;  %v42_v6 = vld [vmem:[#allocation5] sm:$0xff]  ;;  %v552_v40 = vmov 0.0|0.0   ;;  %vm553_vm1 = vmmov 0  }
  0x28   :  { %v49_v7 = vld [vmem:[#allocation5 + $0x38] sm:$0xff]  ;;  %v445_v8 = vpack.c.bf16 %v52_v5, %v45_v3  ;;  %v44_v10 = vld [vmem:[#allocation5 + $0x10] sm:$0xff]  ;;  %v51_v11 = vld [vmem:[#allocation5 + $0x48] sm:$0xff]  ;;  %v73_v46 = vshrl.u32 %v72_v45, 7 }
  0x29   :  { %v439_v9 = vpack.c.bf16 %v49_v7, %v42_v6  ;;  %v57_v12 = vld [vmem:[#allocation5 + $0x78] sm:$0xff]  ;;  %438 = vmatprep.subr.bf16.mxu0 %v437_v4  ;;  %v447_v13 = vpack.c.bf16 %v51_v11, %v44_v10  ;;  %v64_v14 = vld [vmem:[#allocation5 + $0xb0] sm:$0xff]  ;;  %v59_v15 = vld [vmem:[#allocation5 + $0x88] sm:$0xff] }
  0x2a   :  { %v66_v16 = vld [vmem:[#allocation5 + $0xc0] sm:$0xff]  ;;  %446 = vmatprep.subr.bf16.mxu1 %v445_v8  ;;  %v441_v17 = vpack.c.bf16 %v64_v14, %v57_v12  ;;  %v56_v19 = vld [vmem:[#allocation5 + $0x70] sm:$0xff]  ;;  %v63_v20 = vld [vmem:[#allocation5 + $0xa8] sm:$0xff]  ;;  %v74_v47 = vsub.s32 0, %v73_v46  ;;  %v78_v49 = vsub.s32 1, %v73_v46  ;;  %v82_v50 = vsub.s32 2, %v73_v46 }
  0x2b   :  { %440 = vmatpush1.bf16.msra.mxu0 %v439_v9  ;;  %v449_v18 = vpack.c.bf16 %v66_v16, %v59_v15  ;;  %v58_v21 = vld [vmem:[#allocation5 + $0x80] sm:$0xff]  ;;  %448 = vmatpush1.bf16.msra.mxu1 %v447_v13  ;;  %v443_v22 = vpack.c.bf16 %v63_v20, %v56_v19  ;;  %v65_v23 = vld [vmem:[#allocation5 + $0xb8] sm:$0xff]  ;;  %v47_v24 = vld [vmem:[#allocation5 + $0x28] sm:$0xff]  ;;  %v86_v51 = vsub.s32 3, %v73_v46  ;;  %v90_v60 = vsub.s32 4, %v73_v46 }
  0x2c   :  { %442 = vmatprep.subr.bf16.mxu0 %v441_v17  ;;  %v451_v25 = vpack.c.bf16 %v65_v23, %v58_v21  ;;  %v54_v26 = vld [vmem:[#allocation5 + $0x60] sm:$0xff]  ;;  %v53_v28 = vld [vmem:[#allocation5 + $0x58] sm:$0xff]  ;;  %v48_v30 = vld [vmem:[#allocation5 + $0x30] sm:$0xff]  ;;  %v94_v1 = vsub.s32 5, %v73_v46 }
  0x2d   :  { %450 = vmatprep.subr.bf16.mxu1 %v449_v18  ;;  %v46_v27 = vld [vmem:[#allocation5 + $0x20] sm:$0xff]  ;;  %v453_v29 = vpack.c.bf16 %v54_v26, %v47_v24  ;;  %v55_v31 = vld [vmem:[#allocation5 + $0x68] sm:$0xff]  ;;  %v61_v32 = vld [vmem:[#allocation5 + $0x98] sm:$0xff] }
  0x2e   :  { %v41_v33 = vld [vmem:[#allocation2] sm:$0xff]  ;;  %v455_v34 = vpack.c.bf16 %v53_v28, %v46_v27  ;;  %v68_v35 = vld [vmem:[#allocation5 + $0xd0] sm:$0xff]  ;;  %v462_v36 = vpack.c.bf16 %v55_v31, %v48_v30  ;;  %v67_v39 = vld [vmem:[#allocation5 + $0xc8] sm:$0xff] }
  0x2f   :  { %444 = vmatpush1.bf16.msra.mxu0 %v443_v22  ;;  %452 = vmatpush1.bf16.msra.mxu1 %v451_v25  ;;  %v457_v37 = vpack.c.bf16 %v68_v35, %v61_v32  ;;  %v60_v38 = vld [vmem:[#allocation5 + $0x90] sm:$0xff]  ;;  %v62_v41 = vld [vmem:[#allocation5 + $0xa0] sm:$0xff]  ;;  %v69_v42 = vld [vmem:[#allocation5 + $0xd8] sm:$0xff] }
  0x30   :  { %454 = vmatprep.subr.bf16.mxu0 %v453_v29  ;;  %461 = vmatprep.subr.bf16.mxu1 %v552_v40  ;;  %v459_v43 = vpack.c.bf16 %v67_v39, %v60_v38  ;;  %v465_v44 = vpack.c.bf16 %v69_v42, %v62_v41  ;;  %v70_v48 = vld [vmem:[%s631_s2] sm:$0xff]  ;;  %s554_s2 = smov [#allocation7]  }
  0x31   :  { %v75_v52 = vrot.slane %v70_v48, %v74_v47  ;;  %v79_v53 = vrot.slane %v70_v48, %v78_v49  ;;  %v83_v54 = vrot.slane %v70_v48, %v82_v50  ;;  %v87_v55 = vrot.slane %v70_v48, %v86_v51  ;;  %s407_s11 = sshll.u32 %s554_s2, 4  ;;  %s408_s11 = int_to_ptr.vmem [resolvable:$true] %s407_s11 }
  0x32   :  { %417 = vmatmul.mubr.msk.f32.vlgmr.msra.gmra.mrb[0].mxu0 %vm107_vm0, %v41_v33  ;;  %418 = vmatmul.mubr.msk.f32.vlgmr.msra.gmra.mrb[0].mxu1 %vm107_vm0, %v41_v33  ;;  %v91_v3 = vrot.slane %v70_v48, %v90_v60  ;;  %v95_v5 = vrot.slane %v70_v48, %v94_v1  ;;  %s519_s12 = scalar_lea.vmem %s408_s11, 896  ;;  %p524_p3 = scmp.lt.s32.totalorder %s408_s11, %s408_s11 }
  0x33   :  { %456 = vmatpush1.bf16.msra.mxu0 %v455_v34  ;;  %463 = vmatpush3.bf16.msra.mxu1 %v462_v36  ;;  %p520_p2 = scmp.ne.s32.totalorder %s408_s11, %s519_s12  ;;  %p525_p4 = scmp.lt.s32.totalorder %s519_s12, %s519_s12 }
  0x34   :  { %458 = vmatprep.subr.bf16.mxu0 %v457_v37  ;;  %464 = vmatprep.subr.bf16.mxu1 %v552_v40 }
  0x35   :  { %317 = vmatprep.mubr.f32.mxu0 %v551_v0  ;;  %434 = vmatprep.mubr.msk.f32.mxu1 %vm553_vm1, %v551_v0  ;;  %v98_v0 = vsub.s32 6, %v73_v46  ;;  %p526_p5 = por %p525_p4, %p524_p3 }
  0x37   :  { %460 = vmatpush1.bf16.msra.mxu0 %v459_v43  ;;  %466 = vmatpush3.bf16.msra.mxu1 %v465_v44  ;;  %v99_v4 = vrot.slane %v70_v48, %v98_v0  ;;  %p527_p6 = pnand %p526_p5, %p520_p2 }
  0x3a   :  { %419 = vmatmul.mubr.msk.f32.vlgmr.msra.gmra.mrb[2].mxu0 %vm107_vm0, %v41_v33  ;;  %435 = vmatmul.mubr.msk.f32.vlgmr.msra.gmra.mrb[2].mxu1 %vm107_vm0, %v41_v33 }
 0x105   :  { %v177_v56 = vpop.f32.mrb[0].mxu0  ;;  %v248_v59 = vpop.f32.mrb[0].mxu1 }
 0x106   :  { %v178_v57 = vadd.f32 %v177_v56, %v75_v52  ;;  %v179_v58 = vpop.f32.mrb[1].mxu0  ;;  %v249_v62 = vadd.f32 %v248_v59, %v83_v54  ;;  %v250_v63 = vpop.f32.mrb[1].mxu1 }
 0x107   :  { %v180_v61 = vadd.f32 %v179_v58, %v79_v53  ;;  %v251_v2 = vadd.f32 %v250_v63, %v87_v55 }
 0x108   :  { %394 = vst [vmem:[#allocation7] sm:$0xff] %v178_v57  ;;  %396 = vst [vmem:[#allocation7 + $0x10] sm:$0xff] %v249_v62 }
 0x109   :  { %395 = vst [vmem:[#allocation7 + $0x8] sm:$0xff] %v180_v61  ;;  %397 = vst [vmem:[#allocation7 + $0x18] sm:$0xff] %v251_v2 }
 0x10d   :  { %v319_v6 = vpop.f32.mrb[2].mxu0  ;;  %v390_v8 = vpop.f32.mrb[2].mxu1 }
 0x10e   :  { %v320_v7 = vadd.f32 %v319_v6, %v91_v3  ;;  %v321_v9 = vpop.f32.mrb[3].mxu0  ;;  %v391_v10 = vadd.f32 %v390_v8, %v99_v4  ;;  %v436_v12 = vpop.f32.mrb[3].mxu1 }
 0x10f   :  { %v322_v11 = vadd.f32 %v321_v9, %v95_v5 }
 0x110   :  { %398 = vst [vmem:[#allocation7 + $0x20] sm:$0xff] %v320_v7  ;;  %400 = vst [vmem:[#allocation7 + $0x30] sm:$0xff] %v391_v10 }
 0x111   :  { %399 = vst [vmem:[#allocation7 + $0x28] sm:$0xff] %v322_v11 }
 0x112   :  { %530 = shalt.err (!%p527_p6)
}
 0x113   :  { %s531_s15 = scalar_lea.hbm %s632_s3, 896 }
 0x114   :  { %p532_p7 = scmp.ne.s32.totalorder %s632_s3, %s531_s15  ;;  %p535_p8 = scmp.lt.u32.totalorder %s531_s15, %s632_s3 }
 0x116   :  { %p537_p9 = pnand %p535_p8, %p532_p7 }
 0x118   :  { %540 = shalt.err (!%p537_p9)
}
 0x119   :  { %410 = dma.vmem_to_hbm [thread:$0]  %s408_s11, 896, %s632_s3, [#allocation4]  }
 0x11a   :  { %545 = dma.done.wait [#allocation4], 896  }
 0x11b   :  { %546 = vsyncadd [#allocation4], 4294966400 }
 0x11c   :  { %414 = vsyncpa [#allocation3], 1 }
 0x11d   :  { %415 = vsyncpa [#allocation6], 1 }
 0x11e   :  { %416 = vsyncpa [#allocation4], 1 }

</bundles_post_ra>
